<compile_context>
chip_gen: v5e
topology: v5e:2x2
jax: 0.10.0
libtpu: 0.0.40
codegen_flags: <defaults>
</compile_context>

<pallas_src>
import functools
import math

import jax
import jax.numpy as jnp
from jax.experimental import pallas as pl
from jax.experimental.pallas import tpu as pltpu

COMPUTE_DTYPE = jnp.bfloat16                       # storage dtype; accumulation stays f32
_MASK_MIN = float(jnp.finfo(jnp.float32).min)      # HF uses torch.finfo(dtype).min


def _vmem_limit_bytes():
    # Leave headroom below physical VMEM (v7x: 64 MiB/TC, v5e/v6e: 128 MiB).
    try:
        cap = int(pltpu.get_tpu_info().vmem_capacity_bytes)
    except Exception:
        cap = 64 * 1024 * 1024
    return min((cap * 3) // 4, 96 * 1024 * 1024)


VMEM_LIMIT = _vmem_limit_bytes()


def _choose_tile(dim, preferred, align):
    """Largest tile <= preferred that is a multiple of `align` and divides `dim`;
    falls back to the full dim (full-extent blocks always satisfy the (8,128) rule)."""
    if dim <= preferred:
        return dim
    t = (preferred // align) * align
    while t >= align:
        if dim % t == 0:
            return t
        t -= align
    return dim


# ----------------------------------------------------------------------------
# Tiled dense (matmul + bias [+ GELU]) with f32 accumulator scratch
# ----------------------------------------------------------------------------

def _dense_kernel(x_ref, w_ref, b_ref, o_ref, acc_ref, *, activation):
    @pl.when(pl.program_id(2) == 0)
    def _():
        acc_ref[...] = jnp.zeros_like(acc_ref)

    acc_ref[...] += jnp.dot(x_ref[...], w_ref[...],
                            preferred_element_type=jnp.float32)

    @pl.when(pl.program_id(2) == pl.num_programs(2) - 1)
    def _():
        y = acc_ref[...] + b_ref[...]
        if activation == "gelu":
            # exact (erf) GELU, matching HF BERT's default hidden_act="gelu"
            y = 0.5 * y * (1.0 + jax.lax.erf(y * 0.7071067811865476))
        o_ref[...] = y.astype(o_ref.dtype)


def dense(x, w, b, activation=None, *, tm=512, tn=768, tk=1536):
    """x: (M, K) @ w: (K, N) + b: (N,) -> (M, N) in COMPUTE_DTYPE, f32 accumulate."""
    M, K = x.shape
    Kw, N = w.shape
    assert K == Kw
    tm = _choose_tile(M, tm, 16)        # 16-row sublane alignment for bf16
    tn = _choose_tile(N, tn, 256)       # 256-multiples feed the 256x256 MXU
    tk = _choose_tile(K, tk, 256)       # full K for BERT-sized GEMMs -> no k grid axis
    x = x.astype(COMPUTE_DTYPE)
    w = w.astype(COMPUTE_DTYPE)
    b2 = b.reshape(1, N).astype(jnp.float32)

    cost = pl.CostEstimate(
        flops=2 * M * N * K,
        transcendentals=M * N if activation == "gelu" else 0,
        bytes_accessed=(M * K + K * N + M * N) * 2 + N * 4,
    )
    return pl.pallas_call(
        functools.partial(_dense_kernel, activation=activation),
        out_shape=jax.ShapeDtypeStruct((M, N), COMPUTE_DTYPE),
        grid=(M // tm, N // tn, K // tk),
        in_specs=[
            pl.BlockSpec((tm, tk), lambda i, j, k: (i, k)),
            pl.BlockSpec((tk, tn), lambda i, j, k: (k, j)),
            pl.BlockSpec((1, tn), lambda i, j, k: (0, j)),
        ],
        out_specs=pl.BlockSpec((tm, tn), lambda i, j, k: (i, j)),
        scratch_shapes=[pltpu.VMEM((tm, tn), jnp.float32)],
        compiler_params=pltpu.CompilerParams(
            dimension_semantics=("parallel", "parallel", "arbitrary"),
            vmem_limit_bytes=VMEM_LIMIT,
        ),
        cost_estimate=cost,
    )(x, w, b2)


# ----------------------------------------------------------------------------
# Dense + bias + residual-add + LayerNorm fused (for the H-wide output GEMMs)
# ----------------------------------------------------------------------------

def _dense_add_ln_kernel(x_ref, w_ref, b_ref, r_ref, g_ref, beta_ref, o_ref,
                         acc_ref, *, eps):
    @pl.when(pl.program_id(1) == 0)
    def _():
        acc_ref[...] = jnp.zeros_like(acc_ref)

    acc_ref[...] += jnp.dot(x_ref[...], w_ref[...],
                            preferred_element_type=jnp.float32)

    @pl.when(pl.program_id(1) == pl.num_programs(1) - 1)
    def _():
        y = acc_ref[...] + b_ref[...] + r_ref[...].astype(jnp.float32)
        mean = jnp.mean(y, axis=-1, keepdims=True)
        var = jnp.mean(jnp.square(y - mean), axis=-1, keepdims=True)
        yn = (y - mean) * jax.lax.rsqrt(var + eps)
        o_ref[...] = (yn * g_ref[...] + beta_ref[...]).astype(o_ref.dtype)


def dense_add_layernorm(x, w, b, residual, gamma, beta, *, eps=1e-12, tm=512, tk=1536):
    """LayerNorm(x @ w + b + residual). N (=H) is kept un-tiled so the LN row fits one block."""
    M, K = x.shape
    Kw, N = w.shape
    assert K == Kw and residual.shape == (M, N)
    tm = _choose_tile(M, tm, 16)
    tk = _choose_tile(K, tk, 256)
    x = x.astype(COMPUTE_DTYPE)
    w = w.astype(COMPUTE_DTYPE)
    r = residual.astype(COMPUTE_DTYPE)
    b2 = b.reshape(1, N).astype(jnp.float32)
    g2 = gamma.reshape(1, N).astype(jnp.float32)
    be2 = beta.reshape(1, N).astype(jnp.float32)

    cost = pl.CostEstimate(
        flops=2 * M * N * K + 10 * M * N,
        transcendentals=0,
        bytes_accessed=(M * K + K * N + 2 * M * N) * 2 + 3 * N * 4,
    )
    return pl.pallas_call(
        functools.partial(_dense_add_ln_kernel, eps=eps),
        out_shape=jax.ShapeDtypeStruct((M, N), COMPUTE_DTYPE),
        grid=(M // tm, K // tk),
        in_specs=[
            pl.BlockSpec((tm, tk), lambda i, k: (i, k)),
            pl.BlockSpec((tk, N), lambda i, k: (k, 0)),
            pl.BlockSpec((1, N), lambda i, k: (0, 0)),
            pl.BlockSpec((tm, N), lambda i, k: (i, 0)),
            pl.BlockSpec((1, N), lambda i, k: (0, 0)),
            pl.BlockSpec((1, N), lambda i, k: (0, 0)),
        ],
        out_specs=pl.BlockSpec((tm, N), lambda i, k: (i, 0)),
        scratch_shapes=[pltpu.VMEM((tm, N), jnp.float32)],
        compiler_params=pltpu.CompilerParams(
            dimension_semantics=("parallel", "arbitrary"),
            vmem_limit_bytes=VMEM_LIMIT,
        ),
        cost_estimate=cost,
    )(x, w, b2, r, g2, be2)


# ----------------------------------------------------------------------------
# Standalone LayerNorm (embeddings), row-tiled
# ----------------------------------------------------------------------------

def _layernorm_kernel(x_ref, g_ref, b_ref, o_ref, *, eps):
    x = x_ref[...].astype(jnp.float32)
    mean = jnp.mean(x, axis=-1, keepdims=True)
    var = jnp.mean(jnp.square(x - mean), axis=-1, keepdims=True)
    y = (x - mean) * jax.lax.rsqrt(var + eps)
    o_ref[...] = (y * g_ref[...] + b_ref[...]).astype(o_ref.dtype)


def layernorm(x, gamma, beta, eps=1e-12):
    M, H = x.shape
    g2 = gamma.reshape(1, H).astype(jnp.float32)
    b2 = beta.reshape(1, H).astype(jnp.float32)
    tm = _choose_tile(M, 2048, 16)     # mem-bound: big row tiles amortize per-step cost
    data_spec = pl.BlockSpec((tm, H), lambda i: (i, 0))
    vec_spec = pl.BlockSpec((1, H), lambda i: (0, 0))
    return pl.pallas_call(
        functools.partial(_layernorm_kernel, eps=eps),
        out_shape=jax.ShapeDtypeStruct((M, H), COMPUTE_DTYPE),
        grid=(M // tm,),
        in_specs=[data_spec, vec_spec, vec_spec],
        out_specs=data_spec,
        compiler_params=pltpu.CompilerParams(
            dimension_semantics=("parallel",),
            vmem_limit_bytes=VMEM_LIMIT,
        ),
    )(x, g2, b2)


# ----------------------------------------------------------------------------
# Flash attention reading directly from the fused (B*S, 3H) QKV buffer,
# writing the context in the merged (B*S, H) layout (no XLA head transposes).
# ----------------------------------------------------------------------------

def _flash_qkv_kernel(q_ref, k_ref, v_ref, bias_ref, o_ref,
                      m_ref, l_ref, acc_ref, *, nheads, dh, scale):
    kv = pl.program_id(2)

    @pl.when(kv == 0)
    def _():
        m_ref[...] = jnp.full_like(m_ref, -jnp.inf)
        l_ref[...] = jnp.zeros_like(l_ref)
        acc_ref[...] = jnp.zeros_like(acc_ref)

    bias = bias_ref[0]                                   # (1, tkv) additive mask, f32

    # Static unroll over heads (nheads is small); per-head slices of the H-wide blocks.
    # TODO(synk): a batched-head einsum after an in-kernel (tq,H)->(tq,nheads,dh)
    # reshape could cut the per-head lane-slice overhead further.
    for h in range(nheads):
        lo, hi = h * dh, (h + 1) * dh
        q_h = q_ref[:, lo:hi] * scale                    # softmax scale folded into Q
        k_h = k_ref[:, lo:hi]
        v_h = v_ref[:, lo:hi]
        s = jax.lax.dot_general(
            q_h, k_h, dimension_numbers=(((1,), (1,)), ((), ())),
            preferred_element_type=jnp.float32)          # (tq, tkv) f32
        s = s + bias

        m_prev = m_ref[h]                                # (tq, 1)
        m_new = jnp.maximum(m_prev, jnp.max(s, axis=-1, keepdims=True))
        alpha = jnp.exp(m_prev - m_new)
        p = jnp.exp(s - m_new)
        l_ref[h] = alpha * l_ref[h] + jnp.sum(p, axis=-1, keepdims=True)
        acc_ref[h] = alpha * acc_ref[h] + jnp.dot(
            p.astype(v_h.dtype), v_h, preferred_element_type=jnp.float32)
        m_ref[h] = m_new

    @pl.when(kv == pl.num_programs(2) - 1)
    def _():
        # Heads are merged back by writing each head into its H-column slice of the
        # (tq, H) output block; the HBM store itself is a lane-dense (tq, H) slab.
        for h in range(nheads):
            ctx = acc_ref[h] * pl.reciprocal(l_ref[h], approx=False)
            o_ref[:, h * dh:(h + 1) * dh] = ctx.astype(o_ref.dtype)


def flash_attention_fused(qkv, bias, B, S, nheads, *, tq=512, tkv=512):
    """qkv: (B*S, 3H) fused projection; bias: (B, 1, S) additive f32 -> ctx (B*S, H)."""
    M, H3 = qkv.shape
    assert M == B * S
    H = H3 // 3
    assert 3 * H == H3
    dh = H // nheads
    assert dh * nheads == H
    assert H % 128 == 0, "fused attention needs hidden size to be a multiple of 128"
    scale = 1.0 / math.sqrt(dh)

    tq = _choose_tile(S, tq, 16)
    tkv = _choose_tile(S, tkv, 16)
    assert S % tq == 0 and S % tkv == 0
    nq, nkv = S // tq, S // tkv

    qkv = qkv.astype(COMPUTE_DTYPE)
    cost = pl.CostEstimate(
        flops=4 * B * nheads * S * S * dh,
        transcendentals=B * nheads * S * S,
        bytes_accessed=4 * B * S * H * 2 + B * S * 4,
    )
    kernel = functools.partial(_flash_qkv_kernel, nheads=nheads, dh=dh, scale=scale)
    return pl.pallas_call(
        kernel,
        out_shape=jax.ShapeDtypeStruct((M, H), COMPUTE_DTYPE),
        grid=(B, nq, nkv),
        in_specs=[
            # Q / K / V read straight out of the fused QKV buffer: column block 0 / 1 / 2.
            pl.BlockSpec((tq, H), lambda b, qi, ki: (b * nq + qi, 0)),
            pl.BlockSpec((tkv, H), lambda b, qi, ki: (b * nkv + ki, 1)),
            pl.BlockSpec((tkv, H), lambda b, qi, ki: (b * nkv + ki, 2)),
            pl.BlockSpec((1, 1, tkv), lambda b, qi, ki: (b, 0, ki)),
        ],
        out_specs=pl.BlockSpec((tq, H), lambda b, qi, ki: (b * nq + qi, 0)),
        scratch_shapes=[
            pltpu.VMEM((nheads, tq, 1), jnp.float32),    # running max m
            pltpu.VMEM((nheads, tq, 1), jnp.float32),    # running sum l
            pltpu.VMEM((nheads, tq, dh), jnp.float32),   # output accumulator
        ],
        compiler_params=pltpu.CompilerParams(
            dimension_semantics=("parallel", "parallel", "arbitrary"),
            vmem_limit_bytes=VMEM_LIMIT,
        ),
        cost_estimate=cost,
    )(qkv, qkv, qkv, bias.astype(jnp.float32))


# ----------------------------------------------------------------------------
# BERT glue built on the kernels above
# ----------------------------------------------------------------------------

def mask_to_bias(mask):
    """(B, S) {0,1} mask -> additive bias (B, 1, S), f32 (stored once, not per head)."""
    B, S = mask.shape
    return ((1.0 - mask.astype(jnp.float32)) * _MASK_MIN).reshape(B, 1, S)


def bert_encoder(hidden, attn_bias, layer_params, nheads):
    """Pallas encoder: 4 pallas_calls per layer (QKV GEMM, fused flash attention,
    attn-out GEMM+add+LN, FFN-up GEMM+GELU, FFN-down GEMM+add+LN)."""
    B, S, H = hidden.shape
    h2 = hidden.reshape(B * S, H)
    for lp in layer_params:
        qkv = dense(h2, lp["wqkv"], lp["bqkv"])                         # (B*S, 3H)
        ctx = flash_attention_fused(qkv, attn_bias, B, S, nheads)       # (B*S, H)
        h2 = dense_add_layernorm(ctx, lp["wo"], lp["bo"], h2, lp["ln1_g"], lp["ln1_b"])
        inter = dense(h2, lp["wi"], lp["bi"], activation="gelu")
        h2 = dense_add_layernorm(inter, lp["wf"], lp["bf"], h2, lp["ln2_g"], lp["ln2_b"])
    return h2.reshape(B, S, H)


def _layernorm_xla(x, gamma, beta, eps=1e-12):
    x = x.astype(jnp.float32)
    mean = jnp.mean(x, axis=-1, keepdims=True)
    var = jnp.mean(jnp.square(x - mean), axis=-1, keepdims=True)
    return ((x - mean) * jax.lax.rsqrt(var + eps) * gamma.astype(jnp.float32)
            + beta.astype(jnp.float32))


def bert_encoder_xla(hidden, attn_bias, layer_params, nheads):
    """Plain-XLA f32 encoder for tiny shapes (QB_BERT: its 'sequence' is only B tokens);
    per review, per-pallas_call / per-grid-step overhead dominates at these sizes."""
    B, S, H = hidden.shape
    dh = H // nheads
    scale = 1.0 / math.sqrt(dh)
    x = hidden.reshape(B * S, H).astype(jnp.float32)
    for lp in layer_params:
        qkv = x @ lp["wqkv"].astype(jnp.float32) + lp["bqkv"].astype(jnp.float32)
        q, k, v = jnp.split(qkv, 3, axis=-1)

        def heads(t):
            return t.reshape(B, S, nheads, dh).transpose(0, 2, 1, 3)

        q, k, v = heads(q), heads(k), heads(v)
        s = jnp.einsum("bhqd,bhkd->bhqk", q, k) * scale + attn_bias[:, :, None, :]
        p = jax.nn.softmax(s, axis=-1)
        ctx = jnp.einsum("bhqk,bhkd->bhqd", p, v).transpose(0, 2, 1, 3).reshape(B * S, H)
        attn_out = ctx @ lp["wo"].astype(jnp.float32) + lp["bo"].astype(jnp.float32)
        x = _layernorm_xla(attn_out + x, lp["ln1_g"], lp["ln1_b"])
        inter = jax.nn.gelu(x @ lp["wi"].astype(jnp.float32) + lp["bi"].astype(jnp.float32),
                            approximate=False)
        ffn = inter @ lp["wf"].astype(jnp.float32) + lp["bf"].astype(jnp.float32)
        x = _layernorm_xla(ffn + x, lp["ln2_g"], lp["ln2_b"])
    return x.reshape(B, S, H)


def bert_embed_ids(input_ids, token_type_ids, p):
    B, S = input_ids.shape
    we = jnp.take(p["word_emb"], input_ids, axis=0).astype(jnp.float32)   # (B, S, H)
    pe = p["pos_emb"][:S][None, :, :].astype(jnp.float32)                 # (1, S, H)
    te = jnp.take(p["type_emb"], token_type_ids, axis=0).astype(jnp.float32)
    emb = we + pe + te
    H = emb.shape[-1]
    out = layernorm(emb.reshape(B * S, H), p["emb_ln_g"], p["emb_ln_b"])
    return out.reshape(B, S, H)


def bert_embed_inputs(inputs_embeds, p, use_pallas):
    # BertEmbeddings with inputs_embeds; token_type_ids = zeros, position_ids = arange.
    B1, S, H = inputs_embeds.shape
    pe = p["pos_emb"][:S][None, :, :].astype(jnp.float32)
    te = p["type_emb"][0][None, None, :].astype(jnp.float32)
    emb = inputs_embeds.astype(jnp.float32) + pe + te
    if use_pallas:
        out = layernorm(emb.reshape(B1 * S, H), p["emb_ln_g"], p["emb_ln_b"])
        return out.reshape(B1, S, H)
    return _layernorm_xla(emb, p["emb_ln_g"], p["emb_ln_b"])


def cobert_forward(qt_params, qb_params, QT_input_ids, QT_token_type_ids,
                   QT_attention_masks):
    B, S = QT_input_ids.shape

    # --- QT_BERT: BertModel over token ids (heavy path -> Pallas kernels) ---
    qt_hidden = bert_embed_ids(QT_input_ids, QT_token_type_ids, qt_params)
    qt_bias = mask_to_bias(QT_attention_masks)
    qt_out = bert_encoder(qt_hidden, qt_bias, qt_params["layers"], qt_params["nheads"])

    # sentence_embeddings = QT_output[0][:, 0]; QB_input = unsqueeze(0)
    sentence_embeddings = qt_out[:, 0]                          # (B, H)
    QB_input = sentence_embeddings[None, :, :]                  # (1, B, H)
    H = QB_input.shape[-1]

    # --- QB_BERT: BertForTokenClassification on inputs_embeds (attention_mask=None) ---
    # Its sequence length is only B tokens; use Pallas only when large enough to
    # amortize per-call / per-grid-step overhead, else plain XLA (perf review).
    qb_use_pallas = (B >= 256) and (B % 8 == 0) and (H % 128 == 0)
    qb_hidden = bert_embed_inputs(QB_input, qb_params, qb_use_pallas)
    qb_bias = jnp.zeros((1, 1, B), jnp.float32)                 # mask of ones
    if qb_use_pallas:
        qb_out = bert_encoder(qb_hidden, qb_bias, qb_params["layers"], qb_params["nheads"])
    else:
        qb_out = bert_encoder_xla(qb_hidden, qb_bias, qb_params["layers"],
                                  qb_params["nheads"])

    # token-classification head (num_labels=1); dropout is identity in eval.
    # Tiny (B,H)x(H,1) GEMV kept in plain XLA (lane-sparse Pallas store costs more).
    logits = (qb_out.reshape(B, H).astype(jnp.float32)
              @ qb_params["cls_w"].astype(jnp.float32)
              + qb_params["cls_b"].astype(jnp.float32))
    return logits  # == QB_output.logits.squeeze(0)  -> (B, 1)


# ----------------------------------------------------------------------------
# Deterministic synthetic parameter initialization
# ----------------------------------------------------------------------------

def _normal(key, shape, std=0.02, dtype=COMPUTE_DTYPE):
    return (std * jax.random.normal(key, shape)).astype(dtype)


def init_layer(key, hidden, intermediate):
    ks = jax.random.split(key, 4)
    return dict(
        wqkv=_normal(ks[0], (hidden, 3 * hidden)),
        bqkv=jnp.zeros((3 * hidden,), jnp.float32),
        wo=_normal(ks[1], (hidden, hidden)), bo=jnp.zeros((hidden,), jnp.float32),
        ln1_g=jnp.ones((hidden,), jnp.float32), ln1_b=jnp.zeros((hidden,), jnp.float32),
        wi=_normal(ks[2], (hidden, intermediate)), bi=jnp.zeros((intermediate,), jnp.float32),
        wf=_normal(ks[3], (intermediate, hidden)), bf=jnp.zeros((hidden,), jnp.float32),
        ln2_g=jnp.ones((hidden,), jnp.float32), ln2_b=jnp.zeros((hidden,), jnp.float32),
    )


def init_bert(key, vocab, hidden, layers, heads, intermediate, max_pos, type_vocab,
              with_token_cls=False):
    ks = jax.random.split(key, 4 + layers)
    p = dict(
        word_emb=_normal(ks[0], (vocab, hidden)),
        pos_emb=_normal(ks[1], (max_pos, hidden)),
        type_emb=_normal(ks[2], (type_vocab, hidden)),
        emb_ln_g=jnp.ones((hidden,), jnp.float32),
        emb_ln_b=jnp.zeros((hidden,), jnp.float32),
        nheads=heads,
        layers=[init_layer(ks[4 + i], hidden, intermediate) for i in range(layers)],
    )
    if with_token_cls:
        p["cls_w"] = _normal(ks[3], (hidden, 1), dtype=jnp.float32)
        p["cls_b"] = jnp.zeros((1,), jnp.float32)
    return p


# TODO(synk): ATTN_BERT and mean_pooling are instantiated in __init__ but never
# used on this forward path; omitted.

if __name__ == "__main__":
    key = jax.random.PRNGKey(0)
    k_qt, k_qb, k_ids = jax.random.split(key, 3)

    # small synthetic config (hidden kept at 128 so the fused QKV attention's
    # 128-lane column blocks are exercised)
    B, S = 2, 8                   # batch, QT sequence length
    H, NH, L, I = 128, 2, 2, 256  # hidden, heads, layers, intermediate
    VOCAB, MAXPOS, NTYPE = 100, 64, 2

    qt_params = init_bert(k_qt, VOCAB, H, L, NH, I, MAXPOS, NTYPE)
    qb_params = init_bert(k_qb, VOCAB, H, L, NH, I, MAXPOS, NTYPE, with_token_cls=True)

    QT_input_ids = jax.random.randint(k_ids, (B, S), 0, VOCAB, dtype=jnp.int32)
    QT_token_type_ids = jnp.zeros((B, S), jnp.int32)
    QT_attention_masks = jnp.ones((B, S), jnp.float32)

    logits = cobert_forward(qt_params, qb_params, QT_input_ids, QT_token_type_ids,
                            QT_attention_masks)
    logits = jax.block_until_ready(logits)
    assert logits.shape == (B, 1), logits.shape
    assert bool(jnp.all(jnp.isfinite(logits)))
    print("KERNEL_OK")
</pallas_src>

<mosaic_0001>
module attributes {stable_mosaic.version = 11 : i64} {
  func.func @_layernorm_kernel(%arg0: i32, %arg1: memref<16x128xf32, #tpu.memory_space<vmem>>, %arg2: memref<1x128xf32, #tpu.memory_space<vmem>>, %arg3: memref<1x128xf32, #tpu.memory_space<vmem>>, %arg4: memref<16x128xbf16, #tpu.memory_space<vmem>>) attributes {dimension_semantics = [#tpu.dimension_semantics<parallel>], iteration_bounds = array<i64: 1>, scalar_prefetch = 0 : i64, scratch_operands = 0 : i64, tpu.core_type = #tpu.core_type<tc>, window_params = [{transform_indices = @transform_0, window_bounds = array<i64: 16, 128>}, {pipeline_mode = #tpu.pipeline_mode<synchronous>, transform_indices = @transform_1, window_bounds = array<i64: 1, 128>}, {pipeline_mode = #tpu.pipeline_mode<synchronous>, transform_indices = @transform_2, window_bounds = array<i64: 1, 128>}, {transform_indices = @transform_3, window_bounds = array<i64: 16, 128>}]} {
    %c0 = arith.constant 0 : index
    %c0_0 = arith.constant 0 : index
    %0 = vector.load %arg1[%c0, %c0_0] : memref<16x128xf32, #tpu.memory_space<vmem>>, vector<16x128xf32>
    %cst = arith.constant dense<0.000000e+00> : vector<16xf32>
    %1 = vector.multi_reduction <add>, %0, %cst [1] : vector<16x128xf32> to vector<16xf32>
    %2 = vector.shape_cast %1 : vector<16xf32> to vector<16x1xf32>
    %cst_1 = arith.constant 1.280000e+02 : f32
    %3 = vector.broadcast %cst_1 : f32 to vector<16x1xf32>
    %4 = arith.divf %2, %3 : vector<16x1xf32>
    %5 = vector.broadcast %4 : vector<16x1xf32> to vector<16x128xf32>
    %6 = arith.subf %0, %5 : vector<16x128xf32>
    %7 = arith.mulf %6, %6 : vector<16x128xf32>
    %cst_2 = arith.constant dense<0.000000e+00> : vector<16xf32>
    %8 = vector.multi_reduction <add>, %7, %cst_2 [1] : vector<16x128xf32> to vector<16xf32>
    %9 = vector.shape_cast %8 : vector<16xf32> to vector<16x1xf32>
    %cst_3 = arith.constant 1.280000e+02 : f32
    %10 = vector.broadcast %cst_3 : f32 to vector<16x1xf32>
    %11 = arith.divf %9, %10 : vector<16x1xf32>
    %12 = vector.broadcast %4 : vector<16x1xf32> to vector<16x128xf32>
    %13 = arith.subf %0, %12 : vector<16x128xf32>
    %cst_4 = arith.constant 9.99999996E-13 : f32
    %14 = vector.broadcast %cst_4 : f32 to vector<16x1xf32>
    %15 = arith.addf %11, %14 : vector<16x1xf32>
    %16 = math.rsqrt %15 : vector<16x1xf32>
    %17 = vector.broadcast %16 : vector<16x1xf32> to vector<16x128xf32>
    %18 = arith.mulf %13, %17 : vector<16x128xf32>
    %c0_5 = arith.constant 0 : index
    %c0_6 = arith.constant 0 : index
    %19 = vector.load %arg2[%c0_5, %c0_6] : memref<1x128xf32, #tpu.memory_space<vmem>>, vector<1x128xf32>
    %20 = vector.broadcast %19 : vector<1x128xf32> to vector<16x128xf32>
    %21 = arith.mulf %18, %20 : vector<16x128xf32>
    %c0_7 = arith.constant 0 : index
    %c0_8 = arith.constant 0 : index
    %22 = vector.load %arg3[%c0_7, %c0_8] : memref<1x128xf32, #tpu.memory_space<vmem>>, vector<1x128xf32>
    %23 = vector.broadcast %22 : vector<1x128xf32> to vector<16x128xf32>
    %24 = arith.addf %21, %23 : vector<16x128xf32>
    %25 = arith.truncf %24 : vector<16x128xf32> to vector<16x128xbf16>
    %c0_9 = arith.constant 0 : index
    %c0_10 = arith.constant 0 : index
    %26 = vector.load %arg4[%c0_9, %c0_10] : memref<16x128xbf16, #tpu.memory_space<vmem>>, vector<16x128xbf16>
    tpu.vector_store %arg4[%c0_9, %c0_10], %25 {strides = array<i32>} : memref<16x128xbf16, #tpu.memory_space<vmem>>, vector<16x128xbf16>,
    return
  }
  func.func @transform_0(%arg0: i32) -> (i32, i32) {
    %c0_i32 = arith.constant 0 : i32
    %c0_i32_0 = arith.constant 0 : i32
    return %arg0, %c0_i32 : i32, i32
  }
  func.func @transform_1(%arg0: i32) -> (i32, i32) {
    %c0_i32 = arith.constant 0 : i32
    %c0_i32_0 = arith.constant 0 : i32
    %c0_i32_1 = arith.constant 0 : i32
    return %c0_i32, %c0_i32_0 : i32, i32
  }
  func.func @transform_2(%arg0: i32) -> (i32, i32) {
    %c0_i32 = arith.constant 0 : i32
    %c0_i32_0 = arith.constant 0 : i32
    %c0_i32_1 = arith.constant 0 : i32
    return %c0_i32, %c0_i32_0 : i32, i32
  }
  func.func @transform_3(%arg0: i32) -> (i32, i32) {
    %c0_i32 = arith.constant 0 : i32
    %c0_i32_0 = arith.constant 0 : i32
    return %arg0, %c0_i32 : i32, i32
  }
}

</mosaic_0001>

<bundles_post_ra>
// kernel: tpu_custom_call.1
= control target key start
LH: loop header
LB: loop body
LE: loop exit
PB: predicated region body
PF: predicated region fallthrough
CT: control target
= control target key end

     0   :  { %8 = vsyncpa [#allocation3], 0  ;;  %s269_s0 = inlined_call_operand.hbm [shape: f32[16,128], index: 0, kind: input, shape index: {}]   ;;  %s270_s1 = inlined_call_operand.hbm [shape: f32[1,128], index: 1, kind: input, shape index: {}]   ;;  %s271_s2 = inlined_call_operand.vmem [shape: f32[1,128], index: 2, kind: input, shape index: {}]   ;;  %s272_s3 = inlined_call_operand.hbm [shape: bf16[16,128], index: 3, kind: output, shape index: {}]  }
   0x1   :  { %9 = vsyncpa [#allocation6], 0 }
   0x2   :  { %10 = vsyncpa [#allocation4], 0  ;;  %s15_s14 = sshll.u32 %s269_s0, 4  ;;  %s229_s15 = smov [#allocation2]   ;;  %s16_s14 = int_to_ptr.hbm [resolvable:$true] %s15_s14 }
   0x3   :  { %s17_s16 = sshll.u32 %s229_s15, 4  ;;  %s29_s19 = sshll.u32 %s270_s1, 4  ;;  %s18_s16 = int_to_ptr.vmem [resolvable:$true] %s17_s16  ;;  %s30_s19 = int_to_ptr.hbm [resolvable:$true] %s29_s19 }
   0x4   :  { %s230_s20 = smov 128   ;;  %s231_s21 = smov 8  }
   0x5   :  { %23 = dma.hbm_to_vmem [thread:$0]  %s16_s14, 256, %s18_s16, [#allocation3], %s230_s20, %s230_s20, %s231_s21  }
   0x6   :  { %s232_s22 = smov [#allocation5]  }
   0x7   :  { %s31_s23 = sshll.u32 %s232_s22, 4  ;;  %s32_s23 = int_to_ptr.vmem [resolvable:$true] %s31_s23 }
   0x8   :  { %34 = dma.hbm_to_vmem [thread:$0]  %s30_s19, 16, %s32_s23, [#allocation6]  }
   0x9   :  { %223 = dma.done.wait [#allocation3], 256  }
   0xa   :  { %224 = vsyncadd [#allocation3], 4294967040 }
   0xb   :  { %225 = dma.done.wait [#allocation6], 16  }
   0xc   :  { %226 = vsyncadd [#allocation6], 4294967280  ;;  %v45_v0 = vld [vmem:[#allocation2] sm:$0xff]  ;;  %v46_v1 = vld [vmem:[#allocation2 + $0x8] sm:$0xff]  ;;  %v233_v2 = vmov 128.0   ;;  %s234_s24 = smov [#allocation7]  }
   0xd   :  { %47 = vadd.xlane.f32.xlu0 %v45_v0  ;;  %145 = vrcp.f32 %v233_v2  ;;  %v143_v35 = vld [vmem:[#allocation5] ss:$0 sm:$0xff]  ;;  %v144_v41 = vld [vmem:[%s271_s2] ss:$0 sm:$0xff]  ;;  %s114_s25 = sshll.u32 %s234_s24, 4  ;;  %s116_s28 = sshll.u32 %s272_s3, 4  ;;  %s115_s25 = int_to_ptr.vmem [resolvable:$true] %s114_s25  ;;  %s117_s28 = int_to_ptr.hbm [resolvable:$true] %s116_s28 }
   0xe   :  { %s235_s29 = smov 64   ;;  %s236_s30 = smov 4  }
  0x13   :  { %v146_v3 = vpop.eup %145 }
  0x14   :  { %v52_v4 = vmul.f32 128.0, %v146_v3  ;;  %vm56_vm0 = vweird.f32 %v146_v3 }
  0x15   :  { %49 = vadd.xlane.f32.xlu0 %v46_v1 }
  0x16   :  { %v53_v5 = vsub.f32 1.0, %v52_v4 }
  0x18   :  { %v54_v6 = vmul.f32 %v146_v3, %v53_v5 }
  0x1a   :  { %v55_v7 = vadd.f32 %v146_v3, %v54_v6 }
  0x1c   :  { %v57_v8 = vsel %vm56_vm0, %v146_v3, %v55_v7 }
  0x80   :  { %v48_v9 = vpop.xlane.xlu0 %47 }
  0x81   :  { %v58_v10 = vmul.f32 %v57_v8, %v48_v9 }
  0x83   :  { %v60_v11 = vsub.f32 %v45_v0, %v58_v10 }
  0x85   :  { %v62_v12 = vmul.f32 %v60_v11, %v60_v11 }
  0x87   :  { %64 = vadd.xlane.f32.xlu1 %v62_v12 }
  0x88   :  { %v50_v13 = vpop.xlane.xlu0 %49 }
  0x89   :  { %v59_v14 = vmul.f32 %v57_v8, %v50_v13 }
  0x8b   :  { %v61_v15 = vsub.f32 %v46_v1, %v59_v14 }
  0x8d   :  { %v63_v16 = vmul.f32 %v61_v15, %v61_v15 }
  0x8f   :  { %66 = vadd.xlane.f32.xlu1 %v63_v16 }
  0xfa   :  { %v65_v17 = vpop.xlane.xlu1 %64 }
  0xfb   :  { %v68_v18 = vmul.f32 %v65_v17, %v57_v8 }
  0xfd   :  { %v70_v19 = vadd.f32 1e-12, %v68_v18 }
  0xff   :  { %147 = vrsqrt.f32 %v70_v19  ;;  %vm78_vm2 = vweird.f32 %v70_v19 }
 0x102   :  { %v67_v20 = vpop.xlane.xlu1 %66 }
 0x103   :  { %v69_v21 = vmul.f32 %v67_v20, %v57_v8 }
 0x105   :  { %v148_v22 = vpop.eup %147  ;;  %v71_v23 = vadd.f32 1e-12, %v69_v21 }
 0x106   :  { %v73_v24 = vmul.f32 %v148_v22, %v70_v19  ;;  %vm79_vm1 = vweird.f32 %v148_v22 }
 0x107   :  { %149 = vrsqrt.f32 %v71_v23  ;;  %vm80_vm3 = vmor %vm78_vm2, %vm79_vm1  ;;  %vm88_vm5 = vweird.f32 %v71_v23 }
 0x108   :  { %v74_v25 = vmul.f32 %v148_v22, %v73_v24 }
 0x10a   :  { %v75_v26 = vmul.f32 0.5, %v74_v25 }
 0x10c   :  { %v76_v27 = vsub.f32 1.5, %v75_v26 }
 0x10d   :  { %v150_v28 = vpop.eup %149 }
 0x10e   :  { %v77_v29 = vmul.f32 %v148_v22, %v76_v27  ;;  %v83_v30 = vmul.f32 %v150_v28, %v71_v23  ;;  %vm89_vm4 = vweird.f32 %v150_v28 }
 0x10f   :  { %vm90_vm6 = vmor %vm88_vm5, %vm89_vm4 }
 0x110   :  { %v84_v31 = vmul.f32 %v150_v28, %v83_v30  ;;  %v81_v32 = vsel %vm80_vm3, %v148_v22, %v77_v29 }
 0x111   :  { %v92_v36 = vmul.f32 %v81_v32, %v60_v11 }
 0x112   :  { %v85_v33 = vmul.f32 0.5, %v84_v31 }
 0x113   :  { %v98_v39 = vmul.f32 %v143_v35, %v92_v36 }
 0x114   :  { %v86_v34 = vsub.f32 1.5, %v85_v33 }
 0x115   :  { %v104_v43 = vadd.f32 %v144_v41, %v98_v39 }
 0x116   :  { %v87_v37 = vmul.f32 %v150_v28, %v86_v34 }
 0x118   :  { %v91_v38 = vsel %vm90_vm6, %v150_v28, %v87_v37 }
 0x119   :  { %v93_v40 = vmul.f32 %v91_v38, %v61_v15 }
 0x11b   :  { %v99_v42 = vmul.f32 %v143_v35, %v93_v40 }
 0x11d   :  { %v105_v44 = vadd.f32 %v144_v41, %v99_v42 }
 0x11f   :  { %v133_v45 = vpack.c.bf16 %v105_v44, %v104_v43 }
 0x121   :  { %134 = vst [vmem:[#allocation7] sm:$0xff] %v133_v45  }
 0x122   :  { %122 = dma.vmem_to_hbm [thread:$0]  %s115_s25, 128, %s117_s28, [#allocation4], %s235_s29, %s235_s29, %s236_s30  }
 0x123   :  { %227 = dma.done.wait [#allocation4], 128  }
 0x124   :  { %228 = vsyncadd [#allocation4], 4294967168 }
 0x125   :  { %127 = vsyncpa [#allocation3], 1 }
 0x126   :  { %128 = vsyncpa [#allocation6], 1 }
 0x127   :  { %129 = vsyncpa [#allocation4], 1 }

</bundles_post_ra>
